<compile_context>
chip_gen: v7x
topology: tpu7x:2x2x1
jax: 0.10.0
libtpu: 0.0.40
codegen_flags: <defaults>
</compile_context>

<pallas_src>
import jax
import jax.numpy as jnp
from jax.experimental import pallas as pl
from jax.experimental.pallas import tpu as pltpu

_EPS = 1e-5
_K = 3                # kernel_size of all three convs
_PADS = (2, 1, 0)     # conv1 / conv2 / conv3 paddings
_MATMUL_DTYPE = jnp.float32   # bf16 on v6e/v7x at production channel counts


def _geometry(L):
    """Common frame width F and per-stage (frame offset a_s, output length Lout_s).

    Stage s's padded conv input occupies frame columns [a_s, a_s + Lpad_s) of each sample's
    F-wide slot; its valid output occupies [a_s, a_s + Lout_s).  Offsets are chosen so that
    a_{s+1} + pad_{s+1} == a_s, i.e. each stage's (masked) output is already the next
    stage's zero-padded input with no shifting or repacking.
    """
    F = L + 5
    offs = (1, 0, 0)
    louts = (L + 2, L + 2, L)
    return F, offs, louts


def _make_kernel(N, C, L):
    F, offs, louts = _geometry(L)
    T = N * F

    def conv_bn(tape, wmat, vmat, mrow, stage, relu):
        """tape: (C, T) frame tape (zeros outside the stage's padded input region).

        Returns the stage's BN(+relu) output, zeroed outside its valid region, so it can be
        fed directly to the next stage as its padded input.
        """
        lout = louts[stage]
        # Per-tap accumulation: 3 small (C,C)@(C,T) matmuls; tap shift via slice + tiny
        # zero-column concat on register values (no im2col buffer, no scratch round trip).
        y = None
        for k in range(_K):
            if k == 0:
                xk = tape
            else:
                xk = jnp.concatenate(
                    [tape[:, k:], jnp.zeros((C, k), tape.dtype)], axis=1)
            wk = wmat[:, (_K * stage + k) * C:(_K * stage + k + 1) * C]
            t = jnp.dot(wk.astype(_MATMUL_DTYPE), xk.astype(_MATMUL_DTYPE),
                        preferred_element_type=jnp.float32)
            y = t if y is None else y + t
        bias = vmat[:, 3 * stage + 0:3 * stage + 1]
        gamma = vmat[:, 3 * stage + 1:3 * stage + 2]
        beta = vmat[:, 3 * stage + 2:3 * stage + 3]
        y = y + bias

        # Training-mode BatchNorm1d over the N*Lout valid columns, two-pass variance,
        # folded into a per-channel scale/shift (rsqrt on the EUP).
        inv_cnt = 1.0 / float(N * lout)
        mean = jnp.sum(y * mrow, axis=1, keepdims=True) * inv_cnt
        cen = (y - mean) * mrow
        var = jnp.sum(cen * cen, axis=1, keepdims=True) * inv_cnt
        scale = gamma * jax.lax.rsqrt(var + _EPS)
        shift = beta - mean * scale
        out = y * scale + shift
        if relu:
            out = jnp.maximum(out, 0.0)
        # Zero everything outside the valid region: this IS the next stage's zero padding.
        return out * mrow

    def kernel(x_ref, w_ref, v_ref, m_ref, o_ref):
        x = x_ref[...]          # (C, T) frame tape, already zero-padded by the wrapper
        w = w_ref[...]          # (C, 9*C) packed conv weights
        v = v_ref[...]          # (C, 16) packed per-channel bias/gamma/beta
        m = m_ref[...]          # (3, T)  0/1 valid-output-column masks per stage

        y1 = conv_bn(x,  w, v, m[0:1, :], 0, True)    # conv1+bn1+relu
        y2 = conv_bn(y1, w, v, m[1:2, :], 1, True)    # conv2(grouped)+bn2+relu
        y3 = conv_bn(y2, w, v, m[2:3, :], 2, False)   # conv3+bn3

        # Residual: X data sits at frame column offs[0]+pad1 = 3 of each slot, the stage-3
        # output at column 0 -> one left shift of the input tape, add, relu.  Columns past
        # L in each slot are garbage and are sliced away by the wrapper.
        sh = offs[0] + _PADS[0]
        xres = jnp.concatenate([x[:, sh:], jnp.zeros((C, sh), x.dtype)], axis=1)
        o_ref[...] = jnp.maximum(y3 + xres, 0.0).astype(o_ref.dtype)

    return kernel, F, T


def residual_block_forward(x_ncl, params):
    """Forward of ResidualBlock.  x_ncl: (N, C, L) PyTorch NCL layout."""
    N, C, L = x_ncl.shape
    kernel, F, T = _make_kernel(N, C, L)
    F_, offs, louts = _geometry(L)
    W, V = params["W"], params["V"]

    # Lane-dense frame tape: (C, N*F) with sample n's data at columns [n*F+3, n*F+3+L)
    # and zeros elsewhere (this *is* conv1's zero padding).
    lead = offs[0] + _PADS[0]
    x_cnl = jnp.transpose(x_ncl.astype(jnp.float32), (1, 0, 2))            # (C, N, L)
    x_tape = jnp.pad(x_cnl, ((0, 0), (0, 0), (lead, F - lead - L))).reshape(C, T)

    # Per-stage 0/1 masks of the valid output columns (equivalent to
    # (col % F) in [a_s, a_s + Lout_s) computed in-kernel); built once here so the kernel's
    # VPU only ever sees a multiply.
    fc = jnp.arange(F)
    rows = [jnp.tile(((fc >= a) & (fc < a + lo)).astype(jnp.float32), N)
            for a, lo in zip(offs, louts)]
    M = jnp.stack(rows)                                                    # (3, T)

    grid_spec = pltpu.PrefetchScalarGridSpec(
        num_scalar_prefetch=0,
        grid=(1,),
        in_specs=[
            pl.BlockSpec((C, T), lambda i: (0, 0)),
            pl.BlockSpec(W.shape, lambda i: (0, 0)),
            pl.BlockSpec(V.shape, lambda i: (0, 0)),
            pl.BlockSpec((3, T), lambda i: (0, 0)),
        ],
        out_specs=pl.BlockSpec((C, T), lambda i: (0, 0)),
    )
    # TODO(synk): use_1x1conv / strides>1 projection branch (conv4+bn4) omitted - the
    # reference module's shapes only compose for use_1x1conv=False, strides=1.
    # TODO(synk): for production N/L, add a "parallel" grid axis (tile N or L, two-pass or
    # cross-tile BN stats) so v7x uses both TensorCores and DMA overlaps compute.
    out_tape = pl.pallas_call(
        kernel,
        out_shape=jax.ShapeDtypeStruct((C, T), jnp.float32),
        grid_spec=grid_spec,
        compiler_params=pltpu.CompilerParams(dimension_semantics=("arbitrary",)),
    )(x_tape, W, V, M)

    out = out_tape.reshape(C, N, F)[:, :, :L]       # stage-3 output lives at cols [0, L)
    return jnp.transpose(out, (1, 0, 2))            # back to (N, C, L)


def init_params(key, in_channels, out_channels, groups, bot_mul):
    bot = int(round(out_channels * bot_mul))
    assert bot == out_channels == in_channels, \
        "reference module is only shape-consistent when bot == out == in channels"
    G = bot // groups        # PyTorch conv2 group count = bot_channels // groups
    cg = bot // G            # channels per group (in == out per group)

    ks = jax.random.split(key, 12)

    def nrm(k, shape, s=0.1):
        return s * jax.random.normal(k, shape, jnp.float32)

    # PyTorch Conv1d weight layout: (C_out, C_in/groups, K)
    w1 = nrm(ks[0], (bot, in_channels, _K));    b1 = nrm(ks[1], (bot,))
    w2 = nrm(ks[2], (bot, cg, _K));             b2 = nrm(ks[3], (bot,))
    w3 = nrm(ks[4], (out_channels, bot, _K));   b3 = nrm(ks[5], (out_channels,))
    g1 = 1.0 + nrm(ks[6], (out_channels,));  be1 = nrm(ks[7], (out_channels,))
    g2 = 1.0 + nrm(ks[8], (out_channels,));  be2 = nrm(ks[9], (out_channels,))
    g3 = 1.0 + nrm(ks[10], (out_channels,)); be3 = nrm(ks[11], (out_channels,))

    # Grouped conv2 expanded to a dense block-diagonal weight (exact; trivial at C=8).
    # TODO(synk): at production channel counts keep per-group matmuls instead.
    w2d = jnp.zeros((bot, bot, _K), jnp.float32)
    for g in range(G):
        w2d = w2d.at[g * cg:(g + 1) * cg, g * cg:(g + 1) * cg, :].set(w2[g * cg:(g + 1) * cg])

    C = out_channels
    # Lane-dense weight pack: W[:, (3*s+k)*C : (3*s+k+1)*C] = w_s[:, :, k]  -> (C, 9*C).
    def taps(w):
        return [w[:, :, k] for k in range(_K)]
    Wp = jnp.concatenate(taps(w1) + taps(w2d) + taps(w3), axis=1)

    # Lane-dense per-channel params: one (C, 16) tile, cols = [b1,g1,be1,b2,g2,be2,b3,g3,be3].
    Vp = jnp.stack([b1, g1, be1, b2, g2, be2, b3, g3, be3], axis=1)
    Vp = jnp.pad(Vp, ((0, 0), (0, 16 - Vp.shape[1])))

    params = dict(W=Wp, V=Vp)
    pt_params = dict(w1=w1, w2=w2, w3=w3, b1=b1, b2=b2, b3=b3,
                     g1=g1, beta1=be1, g2=g2, beta2=be2, g3=g3, beta3=be3, G=G)
    return params, pt_params


def ref_forward(x, pt):
    """Pure-JAX reference mirroring the PyTorch forward (NCL layout)."""
    def conv(x, w, b, pad, groups=1):
        y = jax.lax.conv_general_dilated(
            x, w, window_strides=(1,), padding=[(pad, pad)],
            dimension_numbers=("NCH", "OIH", "NCH"),
            feature_group_count=groups,
            precision=jax.lax.Precision.HIGHEST)
        return y + b[None, :, None]

    def bn(x, g, bt):
        m = jnp.mean(x, axis=(0, 2), keepdims=True)
        v = jnp.mean((x - m) ** 2, axis=(0, 2), keepdims=True)
        return (x - m) * jax.lax.rsqrt(v + _EPS) * g[None, :, None] + bt[None, :, None]

    y = jax.nn.relu(bn(conv(x, pt["w1"], pt["b1"], 2), pt["g1"], pt["beta1"]))
    y = jax.nn.relu(bn(conv(y, pt["w2"], pt["b2"], 1, groups=pt["G"]), pt["g2"], pt["beta2"]))
    y = bn(conv(y, pt["w3"], pt["b3"], 0), pt["g3"], pt["beta3"])
    return jax.nn.relu(y + x)


if __name__ == "__main__":
    key = jax.random.PRNGKey(0)
    kx, kp = jax.random.split(key)

    # Small shapes consistent with the module: N=2, C_in=C_out=bot=8, L=16,
    # groups=2 (-> 4 conv groups of 2 channels), bot_mul=1.0, strides=1.
    N, C, L = 2, 8, 16
    out_channels, groups, bot_mul = 8, 2, 1.0

    x = jax.random.normal(kx, (N, C, L), jnp.float32)
    params, pt_params = init_params(kp, C, out_channels, groups, bot_mul)

    fwd = jax.jit(residual_block_forward)
    out = jax.block_until_ready(fwd(x, params))

    assert out.shape == (N, out_channels, L)
    ref = ref_forward(x, pt_params)
    if not jnp.allclose(out, ref, atol=2e-3, rtol=2e-3):
        raise AssertionError(
            f"kernel/reference mismatch, max abs err = {float(jnp.max(jnp.abs(out - ref)))}")
    print("KERNEL_OK")
</pallas_src>

<mosaic_0001>
module attributes {stable_mosaic.version = 11 : i64} {
  func.func @kernel(%arg0: i32, %arg1: memref<8x42xf32, #tpu.memory_space<vmem>>, %arg2: memref<8x72xf32, #tpu.memory_space<vmem>>, %arg3: memref<8x16xf32, #tpu.memory_space<vmem>>, %arg4: memref<3x42xf32, #tpu.memory_space<vmem>>, %arg5: memref<8x42xf32, #tpu.memory_space<vmem>>) attributes {dimension_semantics = [#tpu.dimension_semantics<arbitrary>], iteration_bounds = array<i64: 1>, scalar_prefetch = 0 : i64, scratch_operands = 0 : i64, tpu.core_type = #tpu.core_type<tc>, window_params = [{pipeline_mode = #tpu.pipeline_mode<synchronous>, transform_indices = @transform_0, window_bounds = array<i64: 8, 42>}, {pipeline_mode = #tpu.pipeline_mode<synchronous>, transform_indices = @transform_1, window_bounds = array<i64: 8, 72>}, {pipeline_mode = #tpu.pipeline_mode<synchronous>, transform_indices = @transform_2, window_bounds = array<i64: 8, 16>}, {pipeline_mode = #tpu.pipeline_mode<synchronous>, transform_indices = @transform_3, window_bounds = array<i64: 3, 42>}, {pipeline_mode = #tpu.pipeline_mode<synchronous>, transform_indices = @transform_4, window_bounds = array<i64: 8, 42>}]} {
    %c0 = arith.constant 0 : index
    %c0_0 = arith.constant 0 : index
    %0 = vector.load %arg1[%c0, %c0_0] : memref<8x42xf32, #tpu.memory_space<vmem>>, vector<8x42xf32>
    %c0_1 = arith.constant 0 : index
    %c0_2 = arith.constant 0 : index
    %1 = vector.load %arg2[%c0_1, %c0_2] : memref<8x72xf32, #tpu.memory_space<vmem>>, vector<8x72xf32>
    %c0_3 = arith.constant 0 : index
    %c0_4 = arith.constant 0 : index
    %2 = vector.load %arg3[%c0_3, %c0_4] : memref<8x16xf32, #tpu.memory_space<vmem>>, vector<8x16xf32>
    %c0_5 = arith.constant 0 : index
    %c0_6 = arith.constant 0 : index
    %3 = vector.load %arg4[%c0_5, %c0_6] : memref<3x42xf32, #tpu.memory_space<vmem>>, vector<3x42xf32>
    %4 = vector.extract_strided_slice %3 {offsets = [0, 0], sizes = [1, 42], strides = [1, 1]} : vector<3x42xf32> to vector<1x42xf32>
    %5 = vector.extract_strided_slice %1 {offsets = [0, 0], sizes = [8, 8], strides = [1, 1]} : vector<8x72xf32> to vector<8x8xf32>
    %cst = arith.constant dense<0.000000e+00> : vector<8x42xf32>
    %6 = tpu.matmul %5, %0, %cst {dimension_numbers = #tpu.dot_dimension_numbers<[1], [0], [0], [1], [0, 0, 1, 1], [], []>} : vector<8x8xf32>, vector<8x42xf32>, vector<8x42xf32> -> vector<8x42xf32>
    %7 = vector.extract_strided_slice %0 {offsets = [0, 1], sizes = [8, 41], strides = [1, 1]} : vector<8x42xf32> to vector<8x41xf32>
    %cst_7 = arith.constant 0.000000e+00 : f32
    %8 = vector.broadcast %cst_7 : f32 to vector<8x1xf32>
    %9 = tpu.concatenate %7, %8 in 1 : vector<8x41xf32>, vector<8x1xf32> -> vector<8x42xf32>
    %10 = vector.extract_strided_slice %1 {offsets = [0, 8], sizes = [8, 8], strides = [1, 1]} : vector<8x72xf32> to vector<8x8xf32>
    %cst_8 = arith.constant dense<0.000000e+00> : vector<8x42xf32>
    %11 = tpu.matmul %10, %9, %cst_8 {dimension_numbers = #tpu.dot_dimension_numbers<[1], [0], [0], [1], [0, 0, 1, 1], [], []>} : vector<8x8xf32>, vector<8x42xf32>, vector<8x42xf32> -> vector<8x42xf32>
    %12 = arith.addf %6, %11 : vector<8x42xf32>
    %13 = vector.extract_strided_slice %0 {offsets = [0, 2], sizes = [8, 40], strides = [1, 1]} : vector<8x42xf32> to vector<8x40xf32>
    %cst_9 = arith.constant 0.000000e+00 : f32
    %14 = vector.broadcast %cst_9 : f32 to vector<8x2xf32>
    %15 = tpu.concatenate %13, %14 in 1 : vector<8x40xf32>, vector<8x2xf32> -> vector<8x42xf32>
    %16 = vector.extract_strided_slice %1 {offsets = [0, 16], sizes = [8, 8], strides = [1, 1]} : vector<8x72xf32> to vector<8x8xf32>
    %cst_10 = arith.constant dense<0.000000e+00> : vector<8x42xf32>
    %17 = tpu.matmul %16, %15, %cst_10 {dimension_numbers = #tpu.dot_dimension_numbers<[1], [0], [0], [1], [0, 0, 1, 1], [], []>} : vector<8x8xf32>, vector<8x42xf32>, vector<8x42xf32> -> vector<8x42xf32>
    %18 = arith.addf %12, %17 : vector<8x42xf32>
    %19 = vector.extract_strided_slice %2 {offsets = [0, 0], sizes = [8, 1], strides = [1, 1]} : vector<8x16xf32> to vector<8x1xf32>
    %20 = vector.extract_strided_slice %2 {offsets = [0, 1], sizes = [8, 1], strides = [1, 1]} : vector<8x16xf32> to vector<8x1xf32>
    %21 = vector.extract_strided_slice %2 {offsets = [0, 2], sizes = [8, 1], strides = [1, 1]} : vector<8x16xf32> to vector<8x1xf32>
    %22 = vector.broadcast %19 : vector<8x1xf32> to vector<8x42xf32>
    %23 = arith.addf %18, %22 : vector<8x42xf32>
    %24 = vector.broadcast %4 : vector<1x42xf32> to vector<8x42xf32>
    %25 = arith.mulf %23, %24 : vector<8x42xf32>
    %cst_11 = arith.constant dense<0.000000e+00> : vector<8xf32>
    %26 = vector.multi_reduction <add>, %25, %cst_11 [1] : vector<8x42xf32> to vector<8xf32>
    %27 = vector.shape_cast %26 : vector<8xf32> to vector<8x1xf32>
    %cst_12 = arith.constant 0.027777778 : f32
    %28 = vector.broadcast %cst_12 : f32 to vector<8x1xf32>
    %29 = arith.mulf %27, %28 : vector<8x1xf32>
    %30 = vector.broadcast %29 : vector<8x1xf32> to vector<8x42xf32>
    %31 = arith.subf %23, %30 : vector<8x42xf32>
    %32 = vector.broadcast %4 : vector<1x42xf32> to vector<8x42xf32>
    %33 = arith.mulf %31, %32 : vector<8x42xf32>
    %34 = arith.mulf %33, %33 : vector<8x42xf32>
    %cst_13 = arith.constant dense<0.000000e+00> : vector<8xf32>
    %35 = vector.multi_reduction <add>, %34, %cst_13 [1] : vector<8x42xf32> to vector<8xf32>
    %36 = vector.shape_cast %35 : vector<8xf32> to vector<8x1xf32>
    %cst_14 = arith.constant 0.027777778 : f32
    %37 = vector.broadcast %cst_14 : f32 to vector<8x1xf32>
    %38 = arith.mulf %36, %37 : vector<8x1xf32>
    %cst_15 = arith.constant 9.99999974E-6 : f32
    %39 = vector.broadcast %cst_15 : f32 to vector<8x1xf32>
    %40 = arith.addf %38, %39 : vector<8x1xf32>
    %41 = math.rsqrt %40 : vector<8x1xf32>
    %42 = arith.mulf %20, %41 : vector<8x1xf32>
    %43 = arith.mulf %29, %42 : vector<8x1xf32>
    %44 = arith.subf %21, %43 : vector<8x1xf32>
    %45 = vector.broadcast %42 : vector<8x1xf32> to vector<8x42xf32>
    %46 = arith.mulf %23, %45 : vector<8x42xf32>
    %47 = vector.broadcast %44 : vector<8x1xf32> to vector<8x42xf32>
    %48 = arith.addf %46, %47 : vector<8x42xf32>
    %cst_16 = arith.constant 0.000000e+00 : f32
    %49 = vector.broadcast %cst_16 : f32 to vector<8x42xf32>
    %50 = arith.maximumf %48, %49 : vector<8x42xf32>
    %51 = vector.broadcast %4 : vector<1x42xf32> to vector<8x42xf32>
    %52 = arith.mulf %50, %51 : vector<8x42xf32>
    %53 = vector.extract_strided_slice %3 {offsets = [1, 0], sizes = [1, 42], strides = [1, 1]} : vector<3x42xf32> to vector<1x42xf32>
    %54 = vector.extract_strided_slice %1 {offsets = [0, 24], sizes = [8, 8], strides = [1, 1]} : vector<8x72xf32> to vector<8x8xf32>
    %cst_17 = arith.constant dense<0.000000e+00> : vector<8x42xf32>
    %55 = tpu.matmul %54, %52, %cst_17 {dimension_numbers = #tpu.dot_dimension_numbers<[1], [0], [0], [1], [0, 0, 1, 1], [], []>} : vector<8x8xf32>, vector<8x42xf32>, vector<8x42xf32> -> vector<8x42xf32>
    %56 = vector.extract_strided_slice %52 {offsets = [0, 1], sizes = [8, 41], strides = [1, 1]} : vector<8x42xf32> to vector<8x41xf32>
    %cst_18 = arith.constant 0.000000e+00 : f32
    %57 = vector.broadcast %cst_18 : f32 to vector<8x1xf32>
    %58 = tpu.concatenate %56, %57 in 1 : vector<8x41xf32>, vector<8x1xf32> -> vector<8x42xf32>
    %59 = vector.extract_strided_slice %1 {offsets = [0, 32], sizes = [8, 8], strides = [1, 1]} : vector<8x72xf32> to vector<8x8xf32>
    %cst_19 = arith.constant dense<0.000000e+00> : vector<8x42xf32>
    %60 = tpu.matmul %59, %58, %cst_19 {dimension_numbers = #tpu.dot_dimension_numbers<[1], [0], [0], [1], [0, 0, 1, 1], [], []>} : vector<8x8xf32>, vector<8x42xf32>, vector<8x42xf32> -> vector<8x42xf32>
    %61 = arith.addf %55, %60 : vector<8x42xf32>
    %62 = vector.extract_strided_slice %52 {offsets = [0, 2], sizes = [8, 40], strides = [1, 1]} : vector<8x42xf32> to vector<8x40xf32>
    %cst_20 = arith.constant 0.000000e+00 : f32
    %63 = vector.broadcast %cst_20 : f32 to vector<8x2xf32>
    %64 = tpu.concatenate %62, %63 in 1 : vector<8x40xf32>, vector<8x2xf32> -> vector<8x42xf32>
    %65 = vector.extract_strided_slice %1 {offsets = [0, 40], sizes = [8, 8], strides = [1, 1]} : vector<8x72xf32> to vector<8x8xf32>
    %cst_21 = arith.constant dense<0.000000e+00> : vector<8x42xf32>
    %66 = tpu.matmul %65, %64, %cst_21 {dimension_numbers = #tpu.dot_dimension_numbers<[1], [0], [0], [1], [0, 0, 1, 1], [], []>} : vector<8x8xf32>, vector<8x42xf32>, vector<8x42xf32> -> vector<8x42xf32>
    %67 = arith.addf %61, %66 : vector<8x42xf32>
    %68 = vector.extract_strided_slice %2 {offsets = [0, 3], sizes = [8, 1], strides = [1, 1]} : vector<8x16xf32> to vector<8x1xf32>
    %69 = vector.extract_strided_slice %2 {offsets = [0, 4], sizes = [8, 1], strides = [1, 1]} : vector<8x16xf32> to vector<8x1xf32>
    %70 = vector.extract_strided_slice %2 {offsets = [0, 5], sizes = [8, 1], strides = [1, 1]} : vector<8x16xf32> to vector<8x1xf32>
    %71 = vector.broadcast %68 : vector<8x1xf32> to vector<8x42xf32>
    %72 = arith.addf %67, %71 : vector<8x42xf32>
    %73 = vector.broadcast %53 : vector<1x42xf32> to vector<8x42xf32>
    %74 = arith.mulf %72, %73 : vector<8x42xf32>
    %cst_22 = arith.constant dense<0.000000e+00> : vector<8xf32>
    %75 = vector.multi_reduction <add>, %74, %cst_22 [1] : vector<8x42xf32> to vector<8xf32>
    %76 = vector.shape_cast %75 : vector<8xf32> to vector<8x1xf32>
    %cst_23 = arith.constant 0.027777778 : f32
    %77 = vector.broadcast %cst_23 : f32 to vector<8x1xf32>
    %78 = arith.mulf %76, %77 : vector<8x1xf32>
    %79 = vector.broadcast %78 : vector<8x1xf32> to vector<8x42xf32>
    %80 = arith.subf %72, %79 : vector<8x42xf32>
    %81 = vector.broadcast %53 : vector<1x42xf32> to vector<8x42xf32>
    %82 = arith.mulf %80, %81 : vector<8x42xf32>
    %83 = arith.mulf %82, %82 : vector<8x42xf32>
    %cst_24 = arith.constant dense<0.000000e+00> : vector<8xf32>
    %84 = vector.multi_reduction <add>, %83, %cst_24 [1] : vector<8x42xf32> to vector<8xf32>
    %85 = vector.shape_cast %84 : vector<8xf32> to vector<8x1xf32>
    %cst_25 = arith.constant 0.027777778 : f32
    %86 = vector.broadcast %cst_25 : f32 to vector<8x1xf32>
    %87 = arith.mulf %85, %86 : vector<8x1xf32>
    %cst_26 = arith.constant 9.99999974E-6 : f32
    %88 = vector.broadcast %cst_26 : f32 to vector<8x1xf32>
    %89 = arith.addf %87, %88 : vector<8x1xf32>
    %90 = math.rsqrt %89 : vector<8x1xf32>
    %91 = arith.mulf %69, %90 : vector<8x1xf32>
    %92 = arith.mulf %78, %91 : vector<8x1xf32>
    %93 = arith.subf %70, %92 : vector<8x1xf32>
    %94 = vector.broadcast %91 : vector<8x1xf32> to vector<8x42xf32>
    %95 = arith.mulf %72, %94 : vector<8x42xf32>
    %96 = vector.broadcast %93 : vector<8x1xf32> to vector<8x42xf32>
    %97 = arith.addf %95, %96 : vector<8x42xf32>
    %cst_27 = arith.constant 0.000000e+00 : f32
    %98 = vector.broadcast %cst_27 : f32 to vector<8x42xf32>
    %99 = arith.maximumf %97, %98 : vector<8x42xf32>
    %100 = vector.broadcast %53 : vector<1x42xf32> to vector<8x42xf32>
    %101 = arith.mulf %99, %100 : vector<8x42xf32>
    %102 = vector.extract_strided_slice %3 {offsets = [2, 0], sizes = [1, 42], strides = [1, 1]} : vector<3x42xf32> to vector<1x42xf32>
    %103 = vector.extract_strided_slice %1 {offsets = [0, 48], sizes = [8, 8], strides = [1, 1]} : vector<8x72xf32> to vector<8x8xf32>
    %cst_28 = arith.constant dense<0.000000e+00> : vector<8x42xf32>
    %104 = tpu.matmul %103, %101, %cst_28 {dimension_numbers = #tpu.dot_dimension_numbers<[1], [0], [0], [1], [0, 0, 1, 1], [], []>} : vector<8x8xf32>, vector<8x42xf32>, vector<8x42xf32> -> vector<8x42xf32>
    %105 = vector.extract_strided_slice %101 {offsets = [0, 1], sizes = [8, 41], strides = [1, 1]} : vector<8x42xf32> to vector<8x41xf32>
    %cst_29 = arith.constant 0.000000e+00 : f32
    %106 = vector.broadcast %cst_29 : f32 to vector<8x1xf32>
    %107 = tpu.concatenate %105, %106 in 1 : vector<8x41xf32>, vector<8x1xf32> -> vector<8x42xf32>
    %108 = vector.extract_strided_slice %1 {offsets = [0, 56], sizes = [8, 8], strides = [1, 1]} : vector<8x72xf32> to vector<8x8xf32>
    %cst_30 = arith.constant dense<0.000000e+00> : vector<8x42xf32>
    %109 = tpu.matmul %108, %107, %cst_30 {dimension_numbers = #tpu.dot_dimension_numbers<[1], [0], [0], [1], [0, 0, 1, 1], [], []>} : vector<8x8xf32>, vector<8x42xf32>, vector<8x42xf32> -> vector<8x42xf32>
    %110 = arith.addf %104, %109 : vector<8x42xf32>
    %111 = vector.extract_strided_slice %101 {offsets = [0, 2], sizes = [8, 40], strides = [1, 1]} : vector<8x42xf32> to vector<8x40xf32>
    %cst_31 = arith.constant 0.000000e+00 : f32
    %112 = vector.broadcast %cst_31 : f32 to vector<8x2xf32>
    %113 = tpu.concatenate %111, %112 in 1 : vector<8x40xf32>, vector<8x2xf32> -> vector<8x42xf32>
    %114 = vector.extract_strided_slice %1 {offsets = [0, 64], sizes = [8, 8], strides = [1, 1]} : vector<8x72xf32> to vector<8x8xf32>
    %cst_32 = arith.constant dense<0.000000e+00> : vector<8x42xf32>
    %115 = tpu.matmul %114, %113, %cst_32 {dimension_numbers = #tpu.dot_dimension_numbers<[1], [0], [0], [1], [0, 0, 1, 1], [], []>} : vector<8x8xf32>, vector<8x42xf32>, vector<8x42xf32> -> vector<8x42xf32>
    %116 = arith.addf %110, %115 : vector<8x42xf32>
    %117 = vector.extract_strided_slice %2 {offsets = [0, 6], sizes = [8, 1], strides = [1, 1]} : vector<8x16xf32> to vector<8x1xf32>
    %118 = vector.extract_strided_slice %2 {offsets = [0, 7], sizes = [8, 1], strides = [1, 1]} : vector<8x16xf32> to vector<8x1xf32>
    %119 = vector.extract_strided_slice %2 {offsets = [0, 8], sizes = [8, 1], strides = [1, 1]} : vector<8x16xf32> to vector<8x1xf32>
    %120 = vector.broadcast %117 : vector<8x1xf32> to vector<8x42xf32>
    %121 = arith.addf %116, %120 : vector<8x42xf32>
    %122 = vector.broadcast %102 : vector<1x42xf32> to vector<8x42xf32>
    %123 = arith.mulf %121, %122 : vector<8x42xf32>
    %cst_33 = arith.constant dense<0.000000e+00> : vector<8xf32>
    %124 = vector.multi_reduction <add>, %123, %cst_33 [1] : vector<8x42xf32> to vector<8xf32>
    %125 = vector.shape_cast %124 : vector<8xf32> to vector<8x1xf32>
    %cst_34 = arith.constant 3.125000e-02 : f32
    %126 = vector.broadcast %cst_34 : f32 to vector<8x1xf32>
    %127 = arith.mulf %125, %126 : vector<8x1xf32>
    %128 = vector.broadcast %127 : vector<8x1xf32> to vector<8x42xf32>
    %129 = arith.subf %121, %128 : vector<8x42xf32>
    %130 = vector.broadcast %102 : vector<1x42xf32> to vector<8x42xf32>
    %131 = arith.mulf %129, %130 : vector<8x42xf32>
    %132 = arith.mulf %131, %131 : vector<8x42xf32>
    %cst_35 = arith.constant dense<0.000000e+00> : vector<8xf32>
    %133 = vector.multi_reduction <add>, %132, %cst_35 [1] : vector<8x42xf32> to vector<8xf32>
    %134 = vector.shape_cast %133 : vector<8xf32> to vector<8x1xf32>
    %cst_36 = arith.constant 3.125000e-02 : f32
    %135 = vector.broadcast %cst_36 : f32 to vector<8x1xf32>
    %136 = arith.mulf %134, %135 : vector<8x1xf32>
    %cst_37 = arith.constant 9.99999974E-6 : f32
    %137 = vector.broadcast %cst_37 : f32 to vector<8x1xf32>
    %138 = arith.addf %136, %137 : vector<8x1xf32>
    %139 = math.rsqrt %138 : vector<8x1xf32>
    %140 = arith.mulf %118, %139 : vector<8x1xf32>
    %141 = arith.mulf %127, %140 : vector<8x1xf32>
    %142 = arith.subf %119, %141 : vector<8x1xf32>
    %143 = vector.broadcast %140 : vector<8x1xf32> to vector<8x42xf32>
    %144 = arith.mulf %121, %143 : vector<8x42xf32>
    %145 = vector.broadcast %142 : vector<8x1xf32> to vector<8x42xf32>
    %146 = arith.addf %144, %145 : vector<8x42xf32>
    %147 = vector.broadcast %102 : vector<1x42xf32> to vector<8x42xf32>
    %148 = arith.mulf %146, %147 : vector<8x42xf32>
    %149 = vector.extract_strided_slice %0 {offsets = [0, 3], sizes = [8, 39], strides = [1, 1]} : vector<8x42xf32> to vector<8x39xf32>
    %cst_38 = arith.constant 0.000000e+00 : f32
    %150 = vector.broadcast %cst_38 : f32 to vector<8x3xf32>
    %151 = tpu.concatenate %149, %150 in 1 : vector<8x39xf32>, vector<8x3xf32> -> vector<8x42xf32>
    %152 = arith.addf %148, %151 : vector<8x42xf32>
    %cst_39 = arith.constant 0.000000e+00 : f32
    %153 = vector.broadcast %cst_39 : f32 to vector<8x42xf32>
    %154 = arith.maximumf %152, %153 : vector<8x42xf32>
    %c0_40 = arith.constant 0 : index
    %c0_41 = arith.constant 0 : index
    %155 = vector.load %arg5[%c0_40, %c0_41] : memref<8x42xf32, #tpu.memory_space<vmem>>, vector<8x42xf32>
    tpu.vector_store %arg5[%c0_40, %c0_41], %154 {strides = array<i32>} : memref<8x42xf32, #tpu.memory_space<vmem>>, vector<8x42xf32>,
    return
  }
  func.func @transform_0(%arg0: i32) -> (i32, i32) {
    %c0_i32 = arith.constant 0 : i32
    %c0_i32_0 = arith.constant 0 : i32
    %c0_i32_1 = arith.constant 0 : i32
    return %c0_i32, %c0_i32_0 : i32, i32
  }
  func.func @transform_1(%arg0: i32) -> (i32, i32) {
    %c0_i32 = arith.constant 0 : i32
    %c0_i32_0 = arith.constant 0 : i32
    %c0_i32_1 = arith.constant 0 : i32
    return %c0_i32, %c0_i32_0 : i32, i32
  }
  func.func @transform_2(%arg0: i32) -> (i32, i32) {
    %c0_i32 = arith.constant 0 : i32
    %c0_i32_0 = arith.constant 0 : i32
    %c0_i32_1 = arith.constant 0 : i32
    return %c0_i32, %c0_i32_0 : i32, i32
  }
  func.func @transform_3(%arg0: i32) -> (i32, i32) {
    %c0_i32 = arith.constant 0 : i32
    %c0_i32_0 = arith.constant 0 : i32
    %c0_i32_1 = arith.constant 0 : i32
    return %c0_i32, %c0_i32_0 : i32, i32
  }
  func.func @transform_4(%arg0: i32) -> (i32, i32) {
    %c0_i32 = arith.constant 0 : i32
    %c0_i32_0 = arith.constant 0 : i32
    %c0_i32_1 = arith.constant 0 : i32
    return %c0_i32, %c0_i32_0 : i32, i32
  }
}

</mosaic_0001>

<bundles_post_ra>
// kernel: tile.18
= control target key start
LH: loop header
LB: loop body
LE: loop exit
PB: predicated region body
PF: predicated region fallthrough
CT: control target
= control target key end

     0   :  { %s22_s0 = inlined_call_operand.vmem [shape: f32[21], index: 0, kind: input, shape index: {}]   ;;  %s23_s1 = inlined_call_operand.vmem [shape: f32[2,21], index: 1, kind: output, shape index: {}]  }
   0x1   :  { %v4_v0 = vld [vmem:[%s22_s0] ss:$0 sm:$0xff] }
   0x2   :  { %5 = vst [vmem:[%s23_s1] sm:$0x3] %v4_v0 }

// kernel: tile.27
= control target key start
LH: loop header
LB: loop body
LE: loop exit
PB: predicated region body
PF: predicated region fallthrough
CT: control target
= control target key end

     0   :  { %vm7_vm0 = vcmask 171008   ;;  %vm13_vm1 = vcmask 343208   ;;  %s39_s0 = inlined_call_operand.vmem [shape: f32[2,21], index: 0, kind: input, shape index: {}]   ;;  %s40_s1 = inlined_call_operand.vmem [shape: f32[1,42], index: 1, kind: output, shape index: {}]  }
   0x1   :  { %v4_v0 = vld [vmem:[%s39_s0] sm:$0x3]  ;;  %s22_s0 = smov 21  }
   0x2   :  { %5 = vst [vmem:[#allocation1] sm:$0x3] %v4_v0 }
   0x9   :  { %v10_v1 = vld [vmem:[#allocation1 + $0x1] sm:$0x1]   ;;  %v6_v2 = vld [vmem:[#allocation1] sm:$0x1]  }
   0xa   :  { %11 = vrot.lane.b32.xlu0 %v10_v1, %s22_s0  ;;  %8 = vst.msk [vmem:[#allocation0] sm:$0x1] %vm7_vm0, %v6_v2  }
  0x7c   :  { %v12_v3 = vpop.permute.xlu0 %11  }
  0x7d   :  { %14 = vst.msk [vmem:[#allocation0] sm:$0x1] %vm13_vm1, %v12_v3  }
  0x84   :  { %v18_v4 = vld [vmem:[#allocation0] sm:$0x1] }
  0x85   :  { %20 = vst [vmem:[%s40_s1] sm:$0x1] %v18_v4 }

// kernel: residual_block_forward.1
= control target key start
LH: loop header
LB: loop body
LE: loop exit
PB: predicated region body
PF: predicated region fallthrough
CT: control target
= control target key end

     0   :  { %v980_v1 = vmov 0.0   ;;  %s981_s17 = smov 127   ;;  %s982_s18 = smov 126   ;;  %vm30_vm0 = vcmask 64512   ;;  %vm983_vm1 = vmmov 0   ;;  %v984_v3 = vmov 0   ;;  %s1139_s0 = inlined_call_operand.vmem [shape: f32[8,42], index: 0, kind: input, shape index: {}]   ;;  %s1140_s1 = inlined_call_operand.vmem [shape: f32[8,72], index: 1, kind: input, shape index: {}]   ;;  %s1141_s2 = inlined_call_operand.vmem [shape: f32[8,16], index: 2, kind: input, shape index: {}]   ;;  %s1142_s3 = inlined_call_operand.vmem [shape: f32[3,42], index: 3, kind: input, shape index: {}]   ;;  %s1143_s4 = inlined_call_operand.vmem [shape: f32[8,42], index: 4, kind: output, shape index: {}]  }
   0x1   :  { %v1031_v0 = vld [vmem:[%s1139_s0] sm:$0xff]  ;;  %897 = vmatprep.subr.mxu0 %v980_v1  ;;  %902 = vmatprep.subr.mxu1 %v980_v1  ;;  %s985_s0 = smov 120   ;;  %vm25_vm2 = vcmask 334848   ;;  %vm178_vm3 = vcmask 326656   ;;  %v261_v11 = vlaneseq  ;;  %vm266_vm4 = vcmask 343040   ;;  %s990_s24 = smov 96  }
   0x2   :  { %22 = vrot.lane.b32.xlu0 %v1031_v0, %s981_s17  ;;  %175 = vrot.lane.b32.xlu1 %v1031_v0, %s982_s18  ;;  %v1042_v2 = vld [vmem:[%s1140_s1] sm:$0xff]  ;;  %s986_s1 = smov 112   ;;  %v987_v32 = vmov 1   ;;  %v988_v36 = vmov 2   ;;  %s991_s25 = smov 104   ;;  %v992_v47 = vmov 3  }
   0x3   :  { %899 = vmatprep.mubr.msk.f32.mxu0 %vm983_vm1, %v980_v1  ;;  %904 = vmatprep.mubr.msk.f32.mxu1 %vm983_vm1, %v980_v1  ;;  %v1057_v4 = vld [vmem:[%s1141_s2] sm:$0xff]  ;;  %v1072_v12 = vshrl.u32 %v261_v11, 7  ;;  %s993_s26 = smov 88   ;;  %s996_s27 = smov 72   ;;  %vm855_vm5 = vcmask 318464  }
   0x4   :  { %903 = vmatpush3.msra.mxu1 %v1031_v0  ;;  %965 = vset.pattern.permute.xlu0 %v984_v3  ;;  %v1078_v17 = vld [vmem:[%s1142_s3] sm:$0x7]  ;;  %s989_s3 = smov 1   ;;  %s998_s28 = smov 80  }
   0x5   :  { %905 = vmatmul.mubr.msk.f32.vlgmr.msra.gmra.mrb[0].mxu1 %vm30_vm0, %v1042_v2  ;;  %912 = vmatprep.subr.mxu1 %v980_v1  ;;  %v263_v16 = vsub.s32 0, %v1072_v12  ;;  %v540_v59 = vsub.s32 1, %v1072_v12  ;;  %s999_s29 = smov 64   ;;  %s1002_s30 = smov 125  }
   0x6   :  { %28 = vrot.lane.b32.xlu0 %v1042_v2, %s985_s0  ;;  %180 = vrot.lane.b32.xlu1 %v1042_v2, %s986_s1 }
   0x7   :  { %914 = vmatprep.mubr.msk.f32.mxu1 %vm983_vm1, %v980_v1  ;;  %v264_v22 = vrot.slane %v1078_v17, %v263_v16  ;;  %967 = vset.pattern.permute.xlu1 %v988_v36  ;;  %v541_v3 = vrot.slane %v1078_v17, %v540_v59 }
   0xa   :  { %257 = vperm.xlu0 %965, %v1057_v4  }
   0xe   :  { %966 = vset.pattern.permute.xlu0 %v987_v32 }
  0x74   :  { %v23_v5 = vpop.permute.xlu0 %22  ;;  %v176_v6 = vpop.permute.xlu1 %175 }
  0x75   :  { %898 = vmatpush3.msk.msra.mxu0 %vm25_vm2, %v23_v5 }
  0x76   :  { %907 = vmatprep.subr.mxu0 %v980_v1 }
  0x78   :  { %v29_v7 = vpop.permute.xlu0 %28  ;;  %v181_v8 = vpop.permute.xlu1 %180 }
  0x79   :  { %900 = vmatmul.mubr.msk.f32.vlgmr.msra.gmra.mrb[0].mxu0 %vm30_vm0, %v29_v7 }
  0x7a   :  { %908 = vmatpush3.msk.msra.mxu0 %vm178_vm3, %v176_v6  ;;  %909 = vmatprep.mubr.msk.f32.mxu0 %vm983_vm1, %v980_v1 }
  0x7b   :  { %917 = vmatprep.subr.mxu0 %v980_v1 }
  0x7d   :  { %910 = vmatmul.mubr.msk.f32.vlgmr.msra.gmra.mrb[2].mxu0 %vm30_vm0, %v181_v8 }
  0x7e   :  { %919 = vmatprep.mubr.msk.f32.mxu0 %vm983_vm1, %v980_v1 }
  0x89   :  { %v258_v19 = vpop.permute.xlu0 %257 }
  0xd8   :  { %v171_v9 = vpop.f32.mrb[0].mxu1 }
  0xd9   :  { %v906_v10 = vpop.f32.mrb[1].mxu1 }
 0x14c   :  { %v99_v13 = vpop.f32.mrb[0].mxu0 }
 0x14d   :  { %v172_v14 = vadd.f32 %v171_v9, %v99_v13  ;;  %v901_v15 = vpop.f32.mrb[1].mxu0 }
 0x14e   :  { %v994_v15 = vmov 4  }
 0x150   :  { %v250_v18 = vpop.f32.mrb[2].mxu0 }
 0x151   :  { %v254_v20 = vadd.f32 %v250_v18, %v172_v14  ;;  %v911_v21 = vpop.f32.mrb[3].mxu0 }
 0x153   :  { %v260_v23 = vadd.f32 %v258_v19, %v254_v20 }
 0x155   :  { %v265_v24 = vmul.f32 %v264_v22, %v260_v23 }
 0x157   :  { %v267_v25 = vsel %vm266_vm4, %v265_v24, 0.0 }
 0x158   :  { %268 = vadd.xlane.f32.xlu1 %v267_v25 }
 0x1e5   :  { %v269_v26 = vpop.xlane.xlu1 %268 }
 0x1e6   :  { %v270_v27 = vmul.f32 0.027777778, %v269_v26 }
 0x1e8   :  { %v271_v28 = vsub.f32 %v260_v23, %v270_v27 }
 0x1ea   :  { %v272_v29 = vmul.f32 %v271_v28, %v264_v22 }
 0x1ec   :  { %v273_v30 = vmul.f32 %v272_v29, %v272_v29 }
 0x1ee   :  { %v274_v31 = vsel %vm266_vm4, %v273_v30, 0.0 }
 0x1ef   :  { %275 = vadd.xlane.f32.xlu0 %v274_v31  ;;  %v997_v31 = vmov 6  }
 0x27c   :  { %v276_v33 = vpop.xlane.xlu0 %275 }
 0x27d   :  { %v277_v34 = vmul.f32 0.027777778, %v276_v33 }
 0x27f   :  { %v278_v35 = vadd.f32 1e-05, %v277_v34 }
 0x281   :  { %974 = vrsqrt.f32 %v278_v35 }
 0x28b   :  { %v975_v37 = vpop.eup %974 }
 0x28c   :  { %v280_v38 = vmul.f32 %v975_v37, %v1057_v4 }
 0x28e   :  { %289 = vperm.xlu0 %966, %v280_v38   ;;  %v281_v39 = vmul.f32 %v280_v38, %v270_v27 }
 0x290   :  { %283 = vrot.lane.b32.xlu1 %v281_v39, %s989_s3 }
 0x302   :  { %v284_v40 = vpop.permute.xlu1 %283 }
 0x303   :  { %v286_v41 = vsub.f32 %v1057_v4, %v284_v40 }
 0x305   :  { %295 = vperm.xlu1 %967, %v286_v41  }
 0x309   :  { %306 = vrot.lane.b32.xlu1 %v1042_v2, %s990_s24 }
 0x30a   :  { %968 = vset.pattern.permute.xlu1 %v992_v47 }
 0x30d   :  { %380 = vrot.lane.b32.xlu1 %v1042_v2, %s991_s25  ;;  %v290_v42 = vpop.permute.xlu0 %289 }
 0x30e   :  { %v292_v43 = vmul.f32 %v290_v42, %v260_v23  ;;  %v995_v23 = vmov 5   ;;  %v816_v42 = vsub.s32 2, %v1072_v12  ;;  %v1000_v12 = vmov 7  }
 0x310   :  { %v817_v47 = vrot.slane %v1078_v17, %v816_v42  ;;  %v1001_v17 = vmov 8  }
 0x311   :  { %973 = vset.pattern.permute.xlu0 %v1001_v17 }
 0x384   :  { %v296_v44 = vpop.permute.xlu1 %295 }
 0x385   :  { %v298_v45 = vadd.f32 %v296_v44, %v292_v43 }
 0x387   :  { %v299_v46 = vmax.f32 %v298_v45, 0.0 }
 0x388   :  { %v307_v48 = vpop.permute.xlu1 %306 }
 0x389   :  { %v300_v49 = vmul.f32 %v299_v46, %v264_v22 }
 0x38b   :  { %302 = vrot.lane.b32.xlu1 %v300_v49, %s981_s17  ;;  %918 = vmatpush3.msra.mxu0 %v300_v49 }
 0x38c   :  { %v381_v50 = vpop.permute.xlu1 %380  ;;  %927 = vmatprep.subr.mxu0 %v980_v1 }
 0x38d   :  { %920 = vmatmul.mubr.msk.f32.vlgmr.msra.gmra.mrb[4].mxu0 %vm30_vm0, %v381_v50 }
 0x38e   :  { %929 = vmatprep.mubr.msk.f32.mxu0 %vm983_vm1, %v980_v1 }
 0x38f   :  { %454 = vrot.lane.b32.xlu1 %v300_v49, %s982_s18 }
 0x393   :  { %458 = vrot.lane.b32.xlu1 %v1042_v2, %s993_s26 }
 0x397   :  { %534 = vperm.xlu1 %968, %v1057_v4  }
 0x39b   :  { %969 = vset.pattern.permute.xlu1 %v994_v15 }
 0x3fd   :  { %v303_v51 = vpop.permute.xlu1 %302 }
 0x3fe   :  { %913 = vmatpush3.msk.msra.mxu1 %vm25_vm2, %v303_v51 }
 0x3ff   :  { %915 = vmatmul.mubr.msk.f32.vlgmr.msra.gmra.mrb[2].mxu1 %vm30_vm0, %v307_v48  ;;  %922 = vmatprep.subr.mxu1 %v980_v1 }
 0x400   :  { %924 = vmatprep.mubr.msk.f32.mxu1 %vm983_vm1, %v980_v1 }
 0x401   :  { %v455_v52 = vpop.permute.xlu1 %454 }
 0x402   :  { %923 = vmatpush3.msk.msra.mxu1 %vm178_vm3, %v455_v52 }
 0x403   :  { %932 = vmatprep.subr.mxu1 %v980_v1 }
 0x405   :  { %v459_v53 = vpop.permute.xlu1 %458 }
 0x406   :  { %925 = vmatmul.mubr.msk.f32.vlgmr.msra.gmra.mrb[4].mxu1 %vm30_vm0, %v459_v53 }
 0x407   :  { %934 = vmatprep.mubr.msk.f32.mxu1 %vm983_vm1, %v980_v1 }
 0x416   :  { %v535_v61 = vpop.permute.xlu1 %534 }
 0x460   :  { %v450_v54 = vpop.f32.mrb[4].mxu0 }
 0x461   :  { %v921_v55 = vpop.f32.mrb[5].mxu0 }
 0x4d2   :  { %v376_v56 = vpop.f32.mrb[2].mxu1 }
 0x4d3   :  { %v451_v57 = vadd.f32 %v450_v54, %v376_v56  ;;  %v916_v58 = vpop.f32.mrb[3].mxu1 }
 0x4d9   :  { %v528_v60 = vpop.f32.mrb[4].mxu1 }
 0x4da   :  { %v532_v62 = vadd.f32 %v528_v60, %v451_v57  ;;  %v926_v63 = vpop.f32.mrb[5].mxu1 }
 0x4dc   :  { %v537_v5 = vadd.f32 %v535_v61, %v532_v62 }
 0x4de   :  { %v542_v6 = vmul.f32 %v541_v3, %v537_v5 }
 0x4e0   :  { %v543_v7 = vsel %vm266_vm4, %v542_v6, 0.0 }
 0x4e1   :  { %544 = vadd.xlane.f32.xlu1 %v543_v7 }
 0x56e   :  { %v545_v8 = vpop.xlane.xlu1 %544 }
 0x56f   :  { %v546_v9 = vmul.f32 0.027777778, %v545_v8 }
 0x571   :  { %v547_v10 = vsub.f32 %v537_v5, %v546_v9 }
 0x573   :  { %v548_v11 = vmul.f32 %v547_v10, %v541_v3 }
 0x575   :  { %v549_v13 = vmul.f32 %v548_v11, %v548_v11 }
 0x577   :  { %v550_v14 = vsel %vm266_vm4, %v549_v13, 0.0 }
 0x578   :  { %551 = vadd.xlane.f32.xlu0 %v550_v14 }
 0x605   :  { %v552_v16 = vpop.xlane.xlu0 %551 }
 0x606   :  { %v553_v18 = vmul.f32 0.027777778, %v552_v16 }
 0x608   :  { %v554_v19 = vadd.f32 1e-05, %v553_v18 }
 0x60a   :  { %976 = vrsqrt.f32 %v554_v19 }
 0x614   :  { %v977_v20 = vpop.eup %976 }
 0x615   :  { %v556_v21 = vmul.f32 %v977_v20, %v1057_v4 }
 0x617   :  { %565 = vperm.xlu1 %969, %v556_v21   ;;  %v557_v22 = vmul.f32 %v556_v21, %v546_v9 }
 0x619   :  { %559 = vrot.lane.b32.xlu0 %v557_v22, %s989_s3 }
 0x61b   :  { %970 = vset.pattern.permute.xlu1 %v995_v23 }
 0x68b   :  { %v560_v24 = vpop.permute.xlu0 %559 }
 0x68c   :  { %v562_v25 = vsub.f32 %v1057_v4, %v560_v24 }
 0x68e   :  { %571 = vperm.xlu1 %970, %v562_v25  }
 0x692   :  { %582 = vrot.lane.b32.xlu1 %v1042_v2, %s996_s27 }
 0x693   :  { %971 = vset.pattern.permute.xlu1 %v997_v31 }
 0x696   :  { %v566_v26 = vpop.permute.xlu1 %565 }
 0x697   :  { %v568_v27 = vmul.f32 %v566_v26, %v537_v5 }
 0x70d   :  { %v572_v28 = vpop.permute.xlu1 %571 }
 0x70e   :  { %v574_v29 = vadd.f32 %v572_v28, %v568_v27 }
 0x710   :  { %v575_v30 = vmax.f32 %v574_v29, 0.0 }
 0x711   :  { %v583_v33 = vpop.permute.xlu1 %582 }
 0x712   :  { %v576_v32 = vmul.f32 %v575_v30, %v541_v3 }
 0x714   :  { %730 = vrot.lane.b32.xlu1 %v576_v32, %s982_s18  ;;  %578 = vrot.lane.b32.xlu0 %v576_v32, %s981_s17 }
 0x715   :  { %933 = vmatpush3.msra.mxu1 %v576_v32 }
 0x718   :  { %656 = vrot.lane.b32.xlu0 %v1042_v2, %s998_s28  ;;  %810 = vperm.xlu1 %971, %v1057_v4  }
 0x71c   :  { %734 = vrot.lane.b32.xlu0 %v1042_v2, %s999_s29  ;;  %972 = vset.pattern.permute.xlu1 %v1000_v12 }
 0x786   :  { %v579_v34 = vpop.permute.xlu0 %578  ;;  %v731_v35 = vpop.permute.xlu1 %730 }
 0x787   :  { %928 = vmatpush3.msk.msra.mxu0 %vm25_vm2, %v579_v34 }
 0x788   :  { %930 = vmatmul.mubr.msk.f32.vlgmr.msra.gmra.mrb[6].mxu0 %vm30_vm0, %v583_v33  ;;  %937 = vmatprep.subr.mxu0 %v980_v1 }
 0x789   :  { %938 = vmatpush3.msk.msra.mxu0 %vm178_vm3, %v731_v35  ;;  %939 = vmatprep.mubr.msk.f32.mxu0 %vm983_vm1, %v980_v1 }
 0x78a   :  { %v657_v36 = vpop.permute.xlu0 %656 }
 0x78b   :  { %935 = vmatmul.mubr.msk.f32.vlgmr.msra.gmra.mrb[6].mxu1 %vm30_vm0, %v657_v36 }
 0x78e   :  { %v735_v37 = vpop.permute.xlu0 %734 }
 0x78f   :  { %940 = vmatmul.mubr.msk.f32.vlgmr.msra.gmra.mrb[8].mxu0 %vm30_vm0, %v735_v37 }
 0x797   :  { %v811_v44 = vpop.permute.xlu1 %810 }
 0x85b   :  { %v652_v2 = vpop.f32.mrb[6].mxu0 }
 0x85c   :  { %v931_v38 = vpop.f32.mrb[7].mxu0 }
 0x85e   :  { %v726_v39 = vpop.f32.mrb[6].mxu1 }
 0x85f   :  { %v727_v40 = vadd.f32 %v726_v39, %v652_v2  ;;  %v936_v41 = vpop.f32.mrb[7].mxu1 }
 0x862   :  { %v804_v43 = vpop.f32.mrb[8].mxu0 }
 0x863   :  { %v808_v45 = vadd.f32 %v804_v43, %v727_v40  ;;  %v941_v46 = vpop.f32.mrb[9].mxu0 }
 0x865   :  { %v813_v1 = vadd.f32 %v811_v44, %v808_v45 }
 0x867   :  { %v818_v48 = vmul.f32 %v817_v47, %v813_v1 }
 0x869   :  { %v819_v49 = vsel %vm266_vm4, %v818_v48, 0.0 }
 0x86a   :  { %820 = vadd.xlane.f32.xlu0 %v819_v49 }
 0x8f7   :  { %v821_v50 = vpop.xlane.xlu0 %820 }
 0x8f8   :  { %v822_v51 = vmul.f32 0.03125, %v821_v50 }
 0x8fa   :  { %v823_v52 = vsub.f32 %v813_v1, %v822_v51 }
 0x8fc   :  { %v824_v53 = vmul.f32 %v823_v52, %v817_v47 }
 0x8fe   :  { %v825_v54 = vmul.f32 %v824_v53, %v824_v53 }
 0x900   :  { %v826_v55 = vsel %vm266_vm4, %v825_v54, 0.0 }
 0x901   :  { %827 = vadd.xlane.f32.xlu1 %v826_v55 }
 0x98e   :  { %v828_v56 = vpop.xlane.xlu1 %827 }
 0x98f   :  { %v829_v57 = vmul.f32 0.03125, %v828_v56 }
 0x991   :  { %v830_v58 = vadd.f32 1e-05, %v829_v57 }
 0x993   :  { %978 = vrsqrt.f32 %v830_v58 }
 0x99d   :  { %v979_v59 = vpop.eup %978 }
 0x99e   :  { %v832_v60 = vmul.f32 %v979_v59, %v1057_v4 }
 0x9a0   :  { %841 = vperm.xlu1 %972, %v832_v60   ;;  %v833_v61 = vmul.f32 %v832_v60, %v822_v51 }
 0x9a2   :  { %835 = vrot.lane.b32.xlu0 %v833_v61, %s989_s3 }
 0x9a4   :  { %852 = vrot.lane.b32.xlu1 %v1031_v0, %s1002_s30 }
 0xa14   :  { %v836_v62 = vpop.permute.xlu0 %835 }
 0xa15   :  { %v838_v63 = vsub.f32 %v1057_v4, %v836_v62 }
 0xa17   :  { %847 = vperm.xlu0 %973, %v838_v63  }
 0xa1f   :  { %v842_v3 = vpop.permute.xlu1 %841 }
 0xa20   :  { %v844_v5 = vmul.f32 %v842_v3, %v813_v1 }
 0xa23   :  { %v853_v6 = vpop.permute.xlu1 %852 }
 0xa24   :  { %v856_v9 = vsel %vm855_vm5, %v853_v6, 0.0 }
 0xa96   :  { %v848_v7 = vpop.permute.xlu0 %847 }
 0xa97   :  { %v850_v8 = vadd.f32 %v848_v7, %v844_v5 }
 0xa99   :  { %v851_v10 = vmul.f32 %v850_v8, %v817_v47 }
 0xa9b   :  { %v857_v11 = vadd.f32 %v856_v9, %v851_v10 }
 0xa9d   :  { %v858_v13 = vmax.f32 %v857_v11, 0.0 }
 0xa9f   :  { %859 = vst.msk [vmem:[%s1143_s4] sm:$0xff] %vm266_vm4, %v858_v13 }

</bundles_post_ra>
